<compile_context>
chip_gen: v7x
topology: tpu7x:2x2x1
jax: 0.10.0
libtpu: 0.0.40
codegen_flags: <defaults>
</compile_context>

<pallas_src>
import functools

import jax
import jax.numpy as jnp
from jax.experimental import pallas as pl
from jax.experimental.pallas import tpu as pltpu


def _round_up(x: int, m: int) -> int:
    return (x + m - 1) // m * m


def _choose_compute_dtypes():
    """int8 MXU path on v5e/v5p/v6e; bf16 elsewhere (v7x has no int MXU)."""
    try:
        kind = jax.devices()[0].device_kind.lower()
    except Exception:  # pragma: no cover - defensive fallback
        kind = ""
    if ("v5" in kind) or ("v6" in kind):
        return jnp.int8, jnp.int32
    return jnp.bfloat16, jnp.float32


def _choose_tm(batch: int, tm_max: int) -> int:
    """Pick tm so batch padding is minimal; split big batches for 2-TC chips."""
    n_tiles = pl.cdiv(batch, tm_max)
    if n_tiles == 1 and batch >= 128:
        n_tiles = 2  # let the M axis shard across TensorCores on v7x
    return _round_up(pl.cdiv(batch, n_tiles), 8)


def _block_kernel(x_ref, w_ref, thr_ref, out_ref, *, acc_dtype):
    # x_ref:   (TM, Kp)  int8 {0,1}  or bf16 {0,1}
    # w_ref:   (Kp, TN)  int8 {-1,0,+1} or bf16 {-1,0,+1}   (0 only in K pad)
    # thr_ref: (1,  TN)  int32 or f32 effective thresholds
    # out_ref: (TM, TN)  int8 {0,1}
    acc = jnp.dot(x_ref[...], w_ref[...], preferred_element_type=acc_dtype)
    out_ref[...] = (acc > thr_ref[...]).astype(jnp.int8)


def prepare_block_params(masks_bool: jax.Array, thresholds_int: jax.Array,
                         *, tn: int, compute_dtype, acc_dtype):
    """One-time (init-time) preprocessing of the Block parameters.

    Returns:
      w:       (dim_in_p, dim_out_p) compute_dtype, values in {-1, 0, +1}
               (0 only in padded rows/cols)
      thr_eff: (1, dim_out_p)        acc_dtype, thresholds + sum_m - dim_in
               (padded cols get dim_in + 1 so their outputs are 0)
    """
    dim_in, dim_out = masks_bool.shape
    dim_in_p = _round_up(dim_in, 128)
    dim_out_p = _round_up(dim_out, tn)

    m_i = masks_bool.astype(jnp.int32)
    w = 2 * m_i - 1                                             # {-1,+1}
    sum_m = jnp.sum(m_i, axis=0)                                # (dim_out,)
    thr_eff = thresholds_int.astype(jnp.int32) + sum_m - dim_in

    w = jnp.pad(w, ((0, dim_in_p - dim_in), (0, dim_out_p - dim_out)))
    thr_eff = jnp.pad(thr_eff, (0, dim_out_p - dim_out),
                      constant_values=dim_in + 1)

    w = w.astype(compute_dtype)
    thr_eff = thr_eff.astype(acc_dtype).reshape(1, dim_out_p)
    return w, thr_eff


def block_apply(x_bool: jax.Array, w: jax.Array, thr_eff: jax.Array,
                *, tm: int, tn: int, dim_out: int,
                compute_dtype, acc_dtype) -> jax.Array:
    """Applies the pre-folded Block parameters to a boolean input batch."""
    batch, dim_in = x_bool.shape
    dim_in_p, dim_out_p = w.shape
    assert dim_in_p >= dim_in and thr_eff.shape == (1, dim_out_p)
    assert dim_out_p % tn == 0 and dim_in_p % 128 == 0 and tm % 8 == 0

    batch_p = _round_up(batch, tm)

    # Cast x ONCE in the wrapper (no per-grid-step cast in the kernel) and pad
    # batch rows / K columns with zeros (zeros contribute nothing to the dot).
    x = x_bool.astype(compute_dtype)
    x = jnp.pad(x, ((0, batch_p - batch), (0, dim_in_p - dim_in)))

    grid = (batch_p // tm, dim_out_p // tn)

    out_i8 = pl.pallas_call(
        functools.partial(_block_kernel, acc_dtype=acc_dtype),
        out_shape=jax.ShapeDtypeStruct((batch_p, dim_out_p), jnp.int8),
        grid=grid,
        in_specs=[
            pl.BlockSpec((tm, dim_in_p), lambda i, j: (i, 0)),
            pl.BlockSpec((dim_in_p, tn), lambda i, j: (0, j)),
            pl.BlockSpec((1, tn), lambda i, j: (0, j)),
        ],
        out_specs=pl.BlockSpec((tm, tn), lambda i, j: (i, j)),
        compiler_params=pltpu.CompilerParams(
            dimension_semantics=("parallel", "parallel")),
    )(x, w, thr_eff)

    # Padded batch rows may produce 1s (thr_eff can be negative): keep this slice.
    return out_i8[:batch, :dim_out].astype(jnp.bool_)


def block_forward(x_bool: jax.Array, masks_bool: jax.Array,
                  thresholds_int: jax.Array,
                  *, tm_max: int = 256, tn_max: int = 256) -> jax.Array:
    """Convenience wrapper: fold params + run the tiled kernel."""
    batch, dim_in = x_bool.shape
    dim_in_m, dim_out = masks_bool.shape
    assert dim_in == dim_in_m
    assert thresholds_int.shape == (dim_out,)

    compute_dtype, acc_dtype = _choose_compute_dtypes()
    tm = _choose_tm(batch, tm_max)
    tn = min(tn_max, _round_up(dim_out, 128))

    w, thr_eff = prepare_block_params(
        masks_bool, thresholds_int, tn=tn,
        compute_dtype=compute_dtype, acc_dtype=acc_dtype)
    return block_apply(x_bool, w, thr_eff, tm=tm, tn=tn, dim_out=dim_out,
                       compute_dtype=compute_dtype, acc_dtype=acc_dtype)


def block_forward_ref(x_bool, masks_bool, thresholds_int):
    """Pure-JAX reference, literal transcription of the PyTorch forward."""
    x_exp = jnp.broadcast_to(x_bool[:, :, None],
                             (x_bool.shape[0],) + masks_bool.shape)
    x_xnor = jnp.logical_not(jnp.logical_xor(masks_bool[None], x_exp))
    sums = jnp.sum(x_xnor.astype(jnp.int32), axis=1)          # (B, dim_out)
    return sums > thresholds_int[None, :]


def _run_case(key, batch, dim_in, dim_out):
    k_x, k_m, k_t = jax.random.split(key, 3)
    thresholds = jax.random.randint(k_t, (dim_out,), 0, dim_in, dtype=jnp.int32)
    masks = jax.random.uniform(k_m, (dim_in, dim_out)) < 0.5
    x = jax.random.uniform(k_x, (batch, dim_in)) < 0.5

    out = jax.block_until_ready(block_forward(x, masks, thresholds))
    ref = block_forward_ref(x, masks, thresholds)

    assert out.shape == (batch, dim_out)
    assert out.dtype == jnp.bool_
    assert bool(jnp.all(out == ref)), (
        f"Pallas output mismatch vs reference for shape "
        f"({batch},{dim_in},{dim_out})")


if __name__ == "__main__":
    key = jax.random.PRNGKey(0)
    k1, k2 = jax.random.split(key)

    # Small shape consistent with the module (dense binary-neuron layer).
    _run_case(k1, batch=8, dim_in=32, dim_out=16)
    # Larger case exercising multi-tile grid, K/dim_out padding, and the
    # padding-minimizing tm selection (tm=136, zero batch-pad rows).
    _run_case(k2, batch=272, dim_in=96, dim_out=200)

    print("KERNEL_OK")
</pallas_src>

<mosaic_0001>
module attributes {stable_mosaic.version = 11 : i64} {
  func.func @_block_kernel(%arg0: i32, %arg1: i32, %arg2: memref<8x128xbf16, #tpu.memory_space<vmem>>, %arg3: memref<128x128xbf16, #tpu.memory_space<vmem>>, %arg4: memref<1x128xf32, #tpu.memory_space<vmem>>, %arg5: memref<8x128xi8, #tpu.memory_space<vmem>>) attributes {dimension_semantics = [#tpu.dimension_semantics<parallel>, #tpu.dimension_semantics<parallel>], iteration_bounds = array<i64: 1, 1>, scalar_prefetch = 0 : i64, scratch_operands = 0 : i64, tpu.core_type = #tpu.core_type<tc>, window_params = [{transform_indices = @transform_0, window_bounds = array<i64: 8, 128>}, {transform_indices = @transform_1, window_bounds = array<i64: 128, 128>}, {transform_indices = @transform_2, window_bounds = array<i64: 1, 128>}, {transform_indices = @transform_3, window_bounds = array<i64: 8, 128>}]} {
    %c0 = arith.constant 0 : index
    %c0_0 = arith.constant 0 : index
    %0 = vector.load %arg2[%c0, %c0_0] : memref<8x128xbf16, #tpu.memory_space<vmem>>, vector<8x128xbf16>
    %c0_1 = arith.constant 0 : index
    %c0_2 = arith.constant 0 : index
    %1 = vector.load %arg3[%c0_1, %c0_2] : memref<128x128xbf16, #tpu.memory_space<vmem>>, vector<128x128xbf16>
    %cst = arith.constant dense<0.000000e+00> : vector<8x128xf32>
    %2 = tpu.matmul %0, %1, %cst {dimension_numbers = #tpu.dot_dimension_numbers<[1], [0], [0], [1], [0, 0, 1, 1], [], []>} : vector<8x128xbf16>, vector<128x128xbf16>, vector<8x128xf32> -> vector<8x128xf32>
    %c0_3 = arith.constant 0 : index
    %c0_4 = arith.constant 0 : index
    %3 = vector.load %arg4[%c0_3, %c0_4] : memref<1x128xf32, #tpu.memory_space<vmem>>, vector<1x128xf32>
    %4 = vector.broadcast %3 : vector<1x128xf32> to vector<8x128xf32>
    %5 = arith.cmpf ogt, %2, %4 : vector<8x128xf32>
    %6 = arith.extui %5 : vector<8x128xi1> to vector<8x128xi8>
    %c0_5 = arith.constant 0 : index
    %c0_6 = arith.constant 0 : index
    %7 = vector.load %arg5[%c0_5, %c0_6] : memref<8x128xi8, #tpu.memory_space<vmem>>, vector<8x128xi8>
    tpu.vector_store %arg5[%c0_5, %c0_6], %6 {strides = array<i32>} : memref<8x128xi8, #tpu.memory_space<vmem>>, vector<8x128xi8>,
    return
  }
  func.func @transform_0(%arg0: i32, %arg1: i32) -> (i32, i32) {
    %c0_i32 = arith.constant 0 : i32
    %c0_i32_0 = arith.constant 0 : i32
    return %arg0, %c0_i32 : i32, i32
  }
  func.func @transform_1(%arg0: i32, %arg1: i32) -> (i32, i32) {
    %c0_i32 = arith.constant 0 : i32
    %c0_i32_0 = arith.constant 0 : i32
    return %c0_i32, %arg1 : i32, i32
  }
  func.func @transform_2(%arg0: i32, %arg1: i32) -> (i32, i32) {
    %c0_i32 = arith.constant 0 : i32
    %c0_i32_0 = arith.constant 0 : i32
    return %c0_i32, %arg1 : i32, i32
  }
  func.func @transform_3(%arg0: i32, %arg1: i32) -> (i32, i32) {
    %c0_i32 = arith.constant 0 : i32
    return %arg0, %arg1 : i32, i32
  }
}

</mosaic_0001>

<bundles_post_ra>
// kernel: tpu_custom_call.1
= control target key start
LH: loop header
LB: loop body
LE: loop exit
PB: predicated region body
PF: predicated region fallthrough
CT: control target
= control target key end

     0   :  { %8 = vsyncpa [#allocation3], 0  ;;  %s377_s0 = inlined_call_operand.hbm [shape: bf16[8,128], index: 0, kind: input, shape index: {}]   ;;  %s378_s1 = inlined_call_operand.hbm [shape: bf16[128,128], index: 1, kind: input, shape index: {}]   ;;  %s379_s2 = inlined_call_operand.vmem [shape: f32[1,128], index: 2, kind: input, shape index: {}]   ;;  %s380_s3 = inlined_call_operand.hbm [shape: s8[8,128], index: 3, kind: output, shape index: {}]  }
   0x1   :  { %9 = vsyncpa [#allocation6], 0 }
   0x2   :  { %10 = vsyncpa [#allocation4], 0  ;;  %s303_s12 = smov [#allocation2]   ;;  %s304_s14 = smov [#allocation5]  }
   0x3   :  { %s17_s13 = sshll.u32 %s303_s12, 4  ;;  %s26_s15 = sshll.u32 %s304_s14, 4  ;;  %s18_s13 = int_to_ptr.vmem [resolvable:$true] %s17_s13  ;;  %s331_s15 = int_to_ptr.vmem [resolvable:$true] %s26_s15 }
   0x4   :  { %s231_s18 = scalar_lea.hbm %s377_s0, 64 }
   0x5   :  { %p232_p0 = scmp.ne.s32.totalorder %s377_s0, %s231_s18  ;;  %p235_p1 = scmp.lt.u32.totalorder %s231_s18, %s377_s0 }
   0x7   :  { %p237_p2 = pnand %p235_p1, %p232_p0 }
   0x9   :  { %240 = shalt.err (!%p237_p2)
}
   0xa   :  { %s241_s23 = scalar_lea.vmem %s18_s13, 64  ;;  %p246_p4 = scmp.lt.s32.totalorder %s18_s13, %s18_s13 }
   0xb   :  { %p242_p3 = scmp.ne.s32.totalorder %s18_s13, %s241_s23  ;;  %p247_p5 = scmp.lt.s32.totalorder %s241_s23, %s241_s23 }
   0xd   :  { %p248_p6 = por %p247_p5, %p246_p4 }
   0xf   :  { %p249_p7 = pnand %p248_p6, %p242_p3 }
  0x11   :  { %252 = shalt.err (!%p249_p7)
}
  0x12   :  { %20 = dma.hbm_to_vmem [thread:$0]  %s377_s0, 64, %s18_s13, [#allocation3]  }
  0x13   :  { %s253_s28 = scalar_lea.hbm %s378_s1, 1024 }
  0x14   :  { %p254_p8 = scmp.ne.s32.totalorder %s378_s1, %s253_s28  ;;  %p257_p9 = scmp.lt.u32.totalorder %s253_s28, %s378_s1 }
  0x16   :  { %p259_p10 = pnand %p257_p9, %p254_p8 }
  0x18   :  { %262 = shalt.err (!%p259_p10)
}
  0x19   :  { %s263_s6 = scalar_lea.vmem %s331_s15, 1024  ;;  %p268_p12 = scmp.lt.s32.totalorder %s331_s15, %s331_s15 }
  0x1a   :  { %p264_p11 = scmp.ne.s32.totalorder %s331_s15, %s263_s6  ;;  %p269_p13 = scmp.lt.s32.totalorder %s263_s6, %s263_s6 }
  0x1c   :  { %p270_p0 = por %p269_p13, %p268_p12 }
  0x1e   :  { %p271_p1 = pnand %p270_p0, %p264_p11 }
  0x20   :  { %274 = shalt.err (!%p271_p1)
}
  0x21   :  { %s305_s0 = smov 64   ;;  %s306_s7 = smov 4  }
  0x22   :  { %32 = dma.hbm_to_vmem [thread:$0]  %s378_s1, 1024, %s331_s15, [#allocation6], %s305_s0, %s305_s0, %s306_s7  }
  0x23   :  { %297 = dma.done.wait [#allocation3], 64  }
  0x24   :  { %298 = vsyncadd [#allocation3], 4294967232 }
  0x25   :  { %299 = dma.done.wait [#allocation6], 1024  }
  0x26   :  { %300 = vsyncadd [#allocation6], 4294966272  ;;  %v307_v0 = vmov 0.0   ;;  %vm308_vm0 = vmmov 0   ;;  %v223_v1 = vld [vmem:[#allocation5] sm:$0xff]   ;;  %v224_v2 = vld [vmem:[#allocation5 + $0x8] sm:$0xff]  }
  0x27   :  { %195 = vmatprep.subr.bf16.mxu0 %v307_v0  ;;  %211 = vmatprep.mubr.msk.bf16.mxu0 %vm308_vm0, %v307_v0  ;;  %v225_v3 = vld [vmem:[#allocation5 + $0x10] sm:$0xff]   ;;  %v226_v4 = vld [vmem:[#allocation5 + $0x18] sm:$0xff]   ;;  %v227_v5 = vld [vmem:[#allocation5 + $0x20] sm:$0xff]   ;;  %s309_s11 = smov [#allocation7]   ;;  %v310_v15 = vmov 0  }
  0x28   :  { %196 = vmatpush3.bf16.msra.mxu0 %v223_v1  ;;  %v228_v6 = vld [vmem:[#allocation5 + $0x28] sm:$0xff]   ;;  %v229_v7 = vld [vmem:[#allocation5 + $0x30] sm:$0xff]   ;;  %v230_v8 = vld [vmem:[#allocation5 + $0x38] sm:$0xff]   ;;  %s167_s12 = sshll.u32 %s309_s11, 4  ;;  %s168_s12 = int_to_ptr.vmem [resolvable:$true] %s167_s12 }
  0x29   :  { %197 = vmatprep.subr.bf16.mxu0 %v307_v0  ;;  %v44_v9 = vld [vmem:[#allocation2] sm:$0xf]  ;;  %s275_s13 = scalar_lea.vmem %s168_s12, 32  ;;  %p280_p3 = scmp.lt.s32.totalorder %s168_s12, %s168_s12 }
  0x2a   :  { %v185_v10 = vld [vmem:[%s379_s2] ss:$0 sm:$0xff]  ;;  %p276_p2 = scmp.ne.s32.totalorder %s168_s12, %s275_s13  ;;  %p281_p4 = scmp.lt.s32.totalorder %s275_s13, %s275_s13 }
  0x2c   :  { %198 = vmatpush3.bf16.msra.mxu0 %v224_v2  ;;  %p282_p5 = por %p281_p4, %p280_p3 }
  0x2d   :  { %199 = vmatprep.subr.bf16.mxu0 %v307_v0 }
  0x2e   :  { %p283_p6 = pnand %p282_p5, %p276_p2 }
  0x30   :  { %200 = vmatpush3.bf16.msra.mxu0 %v225_v3 }
  0x31   :  { %201 = vmatprep.subr.bf16.mxu0 %v307_v0 }
  0x34   :  { %202 = vmatpush3.bf16.msra.mxu0 %v226_v4 }
  0x35   :  { %203 = vmatprep.subr.bf16.mxu0 %v307_v0 }
  0x38   :  { %204 = vmatpush3.bf16.msra.mxu0 %v227_v5 }
  0x39   :  { %205 = vmatprep.subr.bf16.mxu0 %v307_v0 }
  0x3c   :  { %206 = vmatpush3.bf16.msra.mxu0 %v228_v6 }
  0x3d   :  { %207 = vmatprep.subr.bf16.mxu0 %v307_v0 }
  0x40   :  { %208 = vmatpush3.bf16.msra.mxu0 %v229_v7 }
  0x41   :  { %209 = vmatprep.subr.bf16.mxu0 %v307_v0 }
  0x44   :  { %210 = vmatpush3.bf16.msra.mxu0 %v230_v8 }
  0x47   :  { %212 = vmatmul.mubr.bf16.vlgmr.msra.gmra.mrb[0].mxu0 %v44_v9 }
 0x11a   :  { %v143_v11 = vpop.f32.mrb[0].mxu0 }
 0x11b   :  { %vm156_vm1 = vcmp.gt.f32.partialorder %v143_v11, %v185_v10  ;;  %v213_v12 = vpop.f32.mrb[1].mxu0 }
 0x11c   :  { %vm157_vm2 = vmpackc.low %vm156_vm1, %vm156_vm1  ;;  %v146_v13 = vpop.f32.mrb[2].mxu0 }
 0x11d   :  { %vm158_vm3 = vmpackc.even %vm157_vm2, %vm157_vm2  ;;  %v214_v14 = vpop.f32.mrb[3].mxu0 }
 0x11e   :  { %v159_v16 = vsel %vm158_vm3, 16843009, %v310_v15 }
 0x11f   :  { %160 = vst [vmem:[#allocation7] sm:$0x3] %v159_v16 }
 0x120   :  { %286 = shalt.err (!%p283_p6)
}
 0x121   :  { %s287_s15 = scalar_lea.hbm %s380_s3, 32 }
 0x122   :  { %p288_p7 = scmp.ne.s32.totalorder %s380_s3, %s287_s15  ;;  %p291_p8 = scmp.lt.u32.totalorder %s287_s15, %s380_s3 }
 0x124   :  { %p293_p9 = pnand %p291_p8, %p288_p7 }
 0x126   :  { %296 = shalt.err (!%p293_p9)
}
 0x127   :  { %170 = dma.vmem_to_hbm [thread:$0]  %s168_s12, 32, %s380_s3, [#allocation4]  }
 0x128   :  { %301 = dma.done.wait [#allocation4], 32  }
 0x129   :  { %302 = vsyncadd [#allocation4], 4294967264 }
 0x12a   :  { %174 = vsyncpa [#allocation3], 1 }
 0x12b   :  { %175 = vsyncpa [#allocation6], 1 }
 0x12c   :  { %176 = vsyncpa [#allocation4], 1 }

</bundles_post_ra>
